<compile_context>
chip_gen: v7x
topology: tpu7x:2x2x1
jax: 0.10.0
libtpu: 0.0.40
codegen_flags: <defaults>
</compile_context>

<pallas_src>
import functools

import jax
import jax.numpy as jnp
from jax import lax
from jax.experimental import pallas as pl
from jax.experimental.pallas import tpu as pltpu


def _round_up(x, m):
    return ((x + m - 1) // m) * m


def _infonce_kernel(zr_ref, zc_ref, loss_ref, m_sc, l_sc, p_sc, *,
                    neg_fill, total_rows, rows_pad, n,
                    block_r, block_c, resident_keys):
    i = pl.program_id(0)          # row tile    ("parallel")
    j = pl.program_id(1)          # column tile ("arbitrary": online-softmax reduction)

    @pl.when(j == 0)
    def _():
        m_sc[...] = jnp.full_like(m_sc, -jnp.inf)
        l_sc[...] = jnp.zeros_like(l_sc)
        p_sc[...] = jnp.zeros_like(p_sc)

    zr = zr_ref[...]                                       # (block_r, d_pad) bf16
    if resident_keys:
        c0 = pl.multiple_of(j * block_c, block_c)
        zc = zc_ref[pl.ds(c0, block_c), :]                 # slice of resident keys
    else:
        zc = zc_ref[...]                                   # streamed key tile

    # Operands were L2-normalized and pre-scaled by temperature**-0.5 in the
    # wrapper, so this bf16 MXU matmul (f32 accumulation) directly yields
    # sim / temperature for this tile.
    logits = lax.dot_general(zr, zc, (((1,), (1,)), ((), ())),
                             preferred_element_type=jnp.float32)

    row_ids = i * block_r + lax.broadcasted_iota(jnp.int32, (block_r, block_c), 0)
    col_ids = j * block_c + lax.broadcasted_iota(jnp.int32, (block_r, block_c), 1)

    # Single fused mask: the diagonal (PyTorch fills -10000 BEFORE /T) and the
    # zero-padded key rows.  neg_fill <= -10000/T is finite in f32 and exp() of
    # it underflows to 0, so the LSE matches the reference.
    masked = row_ids == col_ids
    if rows_pad > total_rows:
        masked = masked | (col_ids >= total_rows)
    logits = jnp.where(masked, jnp.float32(neg_fill), logits)

    # Online log-sum-exp across column tiles.
    m_prev = m_sc[...]
    m_new = jnp.maximum(m_prev, jnp.max(logits, axis=-1, keepdims=True))
    alpha = jnp.exp(m_prev - m_new)
    p = jnp.exp(logits - m_new)
    l_sc[...] = alpha * l_sc[...] + jnp.sum(p, axis=-1, keepdims=True)
    m_sc[...] = m_new

    # Positive logit: label(r) = r + n for r < n else r - n.  Only the few
    # column tiles whose range overlaps the label columns of this row tile need
    # to touch p_sc -> scalar-gated with pl.when (skipped on most grid steps).
    r_lo = i * block_r
    r_hi = r_lo + block_r
    c_lo = j * block_c
    c_hi = c_lo + block_c
    hit_plus = (r_lo < n) & (c_hi > r_lo + n) & (c_lo < jnp.minimum(r_hi, n) + n)
    hit_minus = (r_hi > n) & (c_lo < r_hi - n) & (c_hi > jnp.maximum(r_lo, n) - n)

    @pl.when(hit_plus | hit_minus)
    def _():
        rows = i * block_r + lax.broadcasted_iota(jnp.int32, (block_r, 1), 0)
        labels = jnp.where(rows < n, rows + n, rows - n)          # (block_r, 1)
        pos = labels == col_ids                                   # broadcast compare
        p_sc[...] += jnp.sum(jnp.where(pos, logits, 0.0), axis=-1, keepdims=True)

    @pl.when(j == pl.num_programs(1) - 1)
    def _():
        rows = i * block_r + lax.broadcasted_iota(jnp.int32, (block_r, 1), 0)
        lse = m_sc[...] + jnp.log(l_sc[...])
        # Padded query rows are written as 0 so the wrapper mean sees real rows only.
        loss_ref[...] = jnp.where(rows < total_rows, lse - p_sc[...], 0.0)


def infonce_loss(z_i, z_j, temperature=0.07):
    """z_i, z_j: (n, embed_dim). Returns the scalar InfoNCE loss."""
    assert z_i.shape == z_j.shape and z_i.ndim == 2
    n, d = z_i.shape
    total_rows = 2 * n
    temperature = float(temperature)

    # ---- Hoisted out of the kernel: normalize once, fold 1/T into operands.
    z = jnp.concatenate([z_i, z_j], axis=0).astype(jnp.float32)          # (2n, d)
    z = z / jnp.maximum(jnp.sqrt(jnp.sum(z * z, axis=1, keepdims=True)),
                        jnp.float32(1e-12))                              # F.normalize
    z = z * jnp.float32(temperature ** -0.5)     # (z*s)@(z*s).T == (z@z.T)/T
    z = z.astype(jnp.bfloat16)                   # full-rate MXU operands (f32 acc)

    # ---- Lane/sublane padding and tile selection.
    d_pad = _round_up(max(d, 1), 128)
    rows_pad = _round_up(total_rows, 128)

    key_bytes = rows_pad * d_pad * 2                       # bf16 key matrix
    resident_keys = key_bytes <= 8 * 1024 * 1024           # fits easily on v5e/v6e/v7x

    def vmem_est(br, bc):
        # inputs (conservatively assume double-buffering) + f32 logits intermediates.
        keys = 2 * key_bytes if resident_keys else 2 * (bc * d_pad * 2)
        queries = 2 * (br * d_pad * 2)
        logits_tmp = 6 * br * bc * 4
        return keys + queries + logits_tmp + 2 * rows_pad * 4

    budget = 24 * 1024 * 1024                              # < 32 MiB scoped limit
    r_cands = (256, 128, 64) if resident_keys else (512, 256, 128, 64)
    choices = []
    for bc in (1024, 512, 384, 256, 128):
        if rows_pad % bc:
            continue
        for br in r_cands:
            if rows_pad % br == 0 and rows_pad // br >= 2:   # >=2 row tiles for v7x megacore
                choices.append((br, bc))
    block_r, block_c = 64, 128                               # always-valid fallback
    for br, bc in choices:
        if vmem_est(br, bc) <= budget:
            block_r, block_c = br, bc
            break

    z = jnp.pad(z, ((0, rows_pad - total_rows), (0, d_pad - d)))
    grid = (rows_pad // block_r, rows_pad // block_c)

    if resident_keys:
        # Constant block index -> the key matrix is DMA'd into VMEM exactly once.
        key_spec = pl.BlockSpec((rows_pad, d_pad), lambda i, j: (0, 0))
    else:
        key_spec = pl.BlockSpec((block_c, d_pad), lambda i, j: (j, 0))

    # One finite fill value for diagonal + padded columns; exp() underflows to 0,
    # reproducing masked_fill(-10000)/T for any realistic temperature.
    neg_fill = float(min(-10000.0 / temperature, -1.0e6))

    kernel = functools.partial(
        _infonce_kernel,
        neg_fill=neg_fill, total_rows=total_rows, rows_pad=rows_pad, n=n,
        block_r=block_r, block_c=block_c, resident_keys=resident_keys)

    per_row = pl.pallas_call(
        kernel,
        out_shape=jax.ShapeDtypeStruct((rows_pad, 1), jnp.float32),
        grid_spec=pltpu.PrefetchScalarGridSpec(
            num_scalar_prefetch=0,
            grid=grid,
            in_specs=[
                pl.BlockSpec((block_r, d_pad), lambda i, j: (i, 0)),   # query rows
                key_spec,                                              # key rows
            ],
            out_specs=pl.BlockSpec((block_r, 1), lambda i, j: (i, 0)),
            scratch_shapes=[
                pltpu.VMEM((block_r, 1), jnp.float32),   # running max
                pltpu.VMEM((block_r, 1), jnp.float32),   # running sum-exp
                pltpu.VMEM((block_r, 1), jnp.float32),   # positive logit
            ],
        ),
        compiler_params=pltpu.CompilerParams(
            dimension_semantics=("parallel", "arbitrary"),
            vmem_limit_bytes=32 * 1024 * 1024,           # safe on v5e/v6e/v7x
        ),
    )(z, z)

    # CrossEntropyLoss(reduction='mean') over the 2n real rows (padded rows are 0).
    return jnp.sum(per_row) / jnp.float32(total_rows)


if __name__ == "__main__":
    key = jax.random.PRNGKey(0)
    k_i, k_j = jax.random.split(key)

    n, embed_dim = 8, 32
    z_i = jax.random.normal(k_i, (n, embed_dim), jnp.float32)
    z_j = jax.random.normal(k_j, (n, embed_dim), jnp.float32)

    temperature = 0.07
    loss = infonce_loss(z_i, z_j, temperature)
    jax.block_until_ready(loss)

    # Pure-JAX reference (same math as the PyTorch module).
    z = jnp.concatenate([z_i, z_j], axis=0)
    z = z / jnp.maximum(jnp.linalg.norm(z, axis=1, keepdims=True), 1e-12)
    sim = z @ z.T
    sim = jnp.where(jnp.eye(2 * n, dtype=bool), -10000.0, sim)
    logits = sim / temperature
    labels = jnp.concatenate([jnp.arange(n) + n, jnp.arange(n)])
    logp = jax.nn.log_softmax(logits, axis=-1)
    ref = -jnp.mean(logp[jnp.arange(2 * n), labels])

    # Tolerance covers bf16 MXU-operand quantization (~3e-3 absolute logit error)
    # and MXU vs XLA f32 matmul rounding differences.
    assert jnp.allclose(loss, ref, rtol=2e-2, atol=2e-2), (loss, ref)

    print("KERNEL_OK")
</pallas_src>

<mosaic_0001>
module attributes {stable_mosaic.version = 11 : i64} {
  func.func @_infonce_kernel(%arg0: i32, %arg1: i32, %arg2: memref<64x128xbf16, #tpu.memory_space<vmem>>, %arg3: memref<128x128xbf16, #tpu.memory_space<vmem>>, %arg4: memref<64x1xf32, #tpu.memory_space<vmem>>, %arg5: memref<64x1xf32, #tpu.memory_space<vmem>>, %arg6: memref<64x1xf32, #tpu.memory_space<vmem>>, %arg7: memref<64x1xf32, #tpu.memory_space<vmem>>) attributes {dimension_semantics = [#tpu.dimension_semantics<parallel>, #tpu.dimension_semantics<arbitrary>], iteration_bounds = array<i64: 2, 1>, scalar_prefetch = 0 : i64, scratch_operands = 3 : i64, tpu.core_type = #tpu.core_type<tc>, window_params = [{transform_indices = @transform_0, window_bounds = array<i64: 64, 128>}, {pipeline_mode = #tpu.pipeline_mode<synchronous>, transform_indices = @transform_1, window_bounds = array<i64: 128, 128>}, {transform_indices = @transform_2, window_bounds = array<i64: 64, 1>}]} {
    %c0_i32 = arith.constant 0 : i32
    %0 = arith.cmpi eq, %arg1, %c0_i32 : i32
    %1 = arith.extui %0 : i1 to i32
    %c0_i32_0 = arith.constant 0 : i32
    %2 = arith.cmpi ne, %1, %c0_i32_0 : i32
    scf.if %2 {
      %cst_29 = arith.constant 0xFF800000 : f32
      %65 = vector.broadcast %cst_29 : f32 to vector<64x1xf32>
      %c0_30 = arith.constant 0 : index
      %c0_31 = arith.constant 0 : index
      %66 = vector.load %arg5[%c0_30, %c0_31] : memref<64x1xf32, #tpu.memory_space<vmem>>, vector<64x1xf32>
      tpu.vector_store %arg5[%c0_30, %c0_31], %65 {strides = array<i32>} : memref<64x1xf32, #tpu.memory_space<vmem>>, vector<64x1xf32>,
      %cst_32 = arith.constant 0.000000e+00 : f32
      %67 = vector.broadcast %cst_32 : f32 to vector<64x1xf32>
      %c0_33 = arith.constant 0 : index
      %c0_34 = arith.constant 0 : index
      %68 = vector.load %arg6[%c0_33, %c0_34] : memref<64x1xf32, #tpu.memory_space<vmem>>, vector<64x1xf32>
      tpu.vector_store %arg6[%c0_33, %c0_34], %67 {strides = array<i32>} : memref<64x1xf32, #tpu.memory_space<vmem>>, vector<64x1xf32>,
      %cst_35 = arith.constant 0.000000e+00 : f32
      %69 = vector.broadcast %cst_35 : f32 to vector<64x1xf32>
      %c0_36 = arith.constant 0 : index
      %c0_37 = arith.constant 0 : index
      %70 = vector.load %arg7[%c0_36, %c0_37] : memref<64x1xf32, #tpu.memory_space<vmem>>, vector<64x1xf32>
      tpu.vector_store %arg7[%c0_36, %c0_37], %69 {strides = array<i32>} : memref<64x1xf32, #tpu.memory_space<vmem>>, vector<64x1xf32>,
    } else {
    }
    %c0 = arith.constant 0 : index
    %c0_1 = arith.constant 0 : index
    %3 = vector.load %arg2[%c0, %c0_1] : memref<64x128xbf16, #tpu.memory_space<vmem>>, vector<64x128xbf16>
    %c128_i32 = arith.constant 128 : i32
    %4 = arith.muli %arg1, %c128_i32 : i32
    %5 = tpu.assume_multiple %4, 128 : i32
    %6 = arith.index_cast %5 : i32 to index
    %c0_2 = arith.constant 0 : index
    %7 = vector.load %arg3[%6, %c0_2] : memref<128x128xbf16, #tpu.memory_space<vmem>>, vector<128x128xbf16>
    %cst = arith.constant dense<0.000000e+00> : vector<64x128xf32>
    %8 = tpu.matmul %3, %7, %cst {dimension_numbers = #tpu.dot_dimension_numbers<[1], [1], [0], [0], [0, 0, 1, 0], [], []>} : vector<64x128xbf16>, vector<128x128xbf16>, vector<64x128xf32> -> vector<64x128xf32>
    %c64_i32 = arith.constant 64 : i32
    %9 = arith.muli %arg0, %c64_i32 : i32
    %10 = tpu.iota {dimensions = array<i32: 0>} : vector<64x128xi32>
    %11 = vector.broadcast %9 : i32 to vector<64x128xi32>
    %12 = arith.addi %11, %10 : vector<64x128xi32>
    %c128_i32_3 = arith.constant 128 : i32
    %13 = arith.muli %arg1, %c128_i32_3 : i32
    %14 = tpu.iota {dimensions = array<i32: 1>} : vector<64x128xi32>
    %15 = vector.broadcast %13 : i32 to vector<64x128xi32>
    %16 = arith.addi %15, %14 : vector<64x128xi32>
    %17 = arith.cmpi eq, %12, %16 : vector<64x128xi32>
    %c16_i32 = arith.constant 16 : i32
    %18 = vector.broadcast %c16_i32 : i32 to vector<64x128xi32>
    %19 = arith.cmpi sge, %16, %18 : vector<64x128xi32>
    %20 = arith.ori %17, %19 : vector<64x128xi1>
    %cst_4 = arith.constant -1.000000e+06 : f32
    %21 = vector.broadcast %cst_4 : f32 to vector<64x128xf32>
    %22 = arith.select %20, %21, %8 : vector<64x128xi1>, vector<64x128xf32>
    %c0_5 = arith.constant 0 : index
    %c0_6 = arith.constant 0 : index
    %23 = vector.load %arg5[%c0_5, %c0_6] : memref<64x1xf32, #tpu.memory_space<vmem>>, vector<64x1xf32>
    %cst_7 = arith.constant dense<0xFF800000> : vector<64xf32>
    %24 = vector.multi_reduction <maximumf>, %22, %cst_7 [1] : vector<64x128xf32> to vector<64xf32>
    %25 = vector.shape_cast %24 : vector<64xf32> to vector<64x1xf32>
    %26 = arith.maximumf %23, %25 : vector<64x1xf32>
    %27 = arith.subf %23, %26 : vector<64x1xf32>
    %28 = math.exp %27 : vector<64x1xf32>
    %29 = vector.broadcast %26 : vector<64x1xf32> to vector<64x128xf32>
    %30 = arith.subf %22, %29 : vector<64x128xf32>
    %31 = math.exp %30 : vector<64x128xf32>
    %c0_8 = arith.constant 0 : index
    %c0_9 = arith.constant 0 : index
    %32 = vector.load %arg6[%c0_8, %c0_9] : memref<64x1xf32, #tpu.memory_space<vmem>>, vector<64x1xf32>
    %33 = arith.mulf %28, %32 : vector<64x1xf32>
    %cst_10 = arith.constant dense<0.000000e+00> : vector<64xf32>
    %34 = vector.multi_reduction <add>, %31, %cst_10 [1] : vector<64x128xf32> to vector<64xf32>
    %35 = vector.shape_cast %34 : vector<64xf32> to vector<64x1xf32>
    %36 = arith.addf %33, %35 : vector<64x1xf32>
    %c0_11 = arith.constant 0 : index
    %c0_12 = arith.constant 0 : index
    %37 = vector.load %arg6[%c0_11, %c0_12] : memref<64x1xf32, #tpu.memory_space<vmem>>, vector<64x1xf32>
    tpu.vector_store %arg6[%c0_11, %c0_12], %36 {strides = array<i32>} : memref<64x1xf32, #tpu.memory_space<vmem>>, vector<64x1xf32>,
    %c0_13 = arith.constant 0 : index
    %c0_14 = arith.constant 0 : index
    %38 = vector.load %arg5[%c0_13, %c0_14] : memref<64x1xf32, #tpu.memory_space<vmem>>, vector<64x1xf32>
    tpu.vector_store %arg5[%c0_13, %c0_14], %26 {strides = array<i32>} : memref<64x1xf32, #tpu.memory_space<vmem>>, vector<64x1xf32>,
    %c64_i32_15 = arith.constant 64 : i32
    %39 = arith.muli %arg0, %c64_i32_15 : i32
    %c64_i32_16 = arith.constant 64 : i32
    %40 = arith.addi %39, %c64_i32_16 : i32
    %c128_i32_17 = arith.constant 128 : i32
    %41 = arith.muli %arg1, %c128_i32_17 : i32
    %c128_i32_18 = arith.constant 128 : i32
    %42 = arith.addi %41, %c128_i32_18 : i32
    %c8_i32 = arith.constant 8 : i32
    %43 = arith.cmpi slt, %39, %c8_i32 : i32
    %c8_i32_19 = arith.constant 8 : i32
    %44 = arith.addi %39, %c8_i32_19 : i32
    %45 = arith.cmpi sgt, %42, %44 : i32
    %46 = arith.andi %43, %45 : i1
    %c8_i32_20 = arith.constant 8 : i32
    %47 = arith.minsi %40, %c8_i32_20 : i32
    %c8_i32_21 = arith.constant 8 : i32
    %48 = arith.addi %47, %c8_i32_21 : i32
    %49 = arith.cmpi slt, %41, %48 : i32
    %50 = arith.andi %46, %49 : i1
    %c8_i32_22 = arith.constant 8 : i32
    %51 = arith.cmpi sgt, %40, %c8_i32_22 : i32
    %c8_i32_23 = arith.constant 8 : i32
    %52 = arith.subi %40, %c8_i32_23 : i32
    %53 = arith.cmpi slt, %41, %52 : i32
    %54 = arith.andi %51, %53 : i1
    %c8_i32_24 = arith.constant 8 : i32
    %55 = arith.maxsi %39, %c8_i32_24 : i32
    %c8_i32_25 = arith.constant 8 : i32
    %56 = arith.subi %55, %c8_i32_25 : i32
    %57 = arith.cmpi sgt, %42, %56 : i32
    %58 = arith.andi %54, %57 : i1
    %59 = arith.ori %50, %58 : i1
    %60 = arith.extui %59 : i1 to i32
    %c0_i32_26 = arith.constant 0 : i32
    %61 = arith.cmpi ne, %60, %c0_i32_26 : i32
    scf.if %61 {
      %c64_i32_29 = arith.constant 64 : i32
      %65 = arith.muli %arg0, %c64_i32_29 : i32
      %66 = tpu.iota {dimensions = array<i32: 0>} : vector<64x1xi32>
      %67 = vector.broadcast %65 : i32 to vector<64x1xi32>
      %68 = arith.addi %67, %66 : vector<64x1xi32>
      %c8_i32_30 = arith.constant 8 : i32
      %69 = vector.broadcast %c8_i32_30 : i32 to vector<64x1xi32>
      %70 = arith.cmpi slt, %68, %69 : vector<64x1xi32>
      %c8_i32_31 = arith.constant 8 : i32
      %71 = vector.broadcast %c8_i32_31 : i32 to vector<64x1xi32>
      %72 = arith.addi %68, %71 : vector<64x1xi32>
      %c8_i32_32 = arith.constant 8 : i32
      %73 = vector.broadcast %c8_i32_32 : i32 to vector<64x1xi32>
      %74 = arith.subi %68, %73 : vector<64x1xi32>
      %75 = arith.select %70, %72, %74 : vector<64x1xi1>, vector<64x1xi32>
      %76 = vector.broadcast %75 : vector<64x1xi32> to vector<64x128xi32>
      %77 = arith.cmpi eq, %76, %16 : vector<64x128xi32>
      %c0_33 = arith.constant 0 : index
      %c0_34 = arith.constant 0 : index
      %78 = vector.load %arg7[%c0_33, %c0_34] : memref<64x1xf32, #tpu.memory_space<vmem>>, vector<64x1xf32>
      %cst_35 = arith.constant 0.000000e+00 : f32
      %79 = vector.broadcast %cst_35 : f32 to vector<64x128xf32>
      %80 = arith.select %77, %22, %79 : vector<64x128xi1>, vector<64x128xf32>
      %cst_36 = arith.constant dense<0.000000e+00> : vector<64xf32>
      %81 = vector.multi_reduction <add>, %80, %cst_36 [1] : vector<64x128xf32> to vector<64xf32>
      %82 = vector.shape_cast %81 : vector<64xf32> to vector<64x1xf32>
      %83 = arith.addf %78, %82 : vector<64x1xf32>
      %c0_37 = arith.constant 0 : index
      %c0_38 = arith.constant 0 : index
      %84 = vector.load %arg7[%c0_37, %c0_38] : memref<64x1xf32, #tpu.memory_space<vmem>>, vector<64x1xf32>
      tpu.vector_store %arg7[%c0_37, %c0_38], %83 {strides = array<i32>} : memref<64x1xf32, #tpu.memory_space<vmem>>, vector<64x1xf32>,
    } else {
    }
    %c0_i32_27 = arith.constant 0 : i32
    %62 = arith.cmpi eq, %arg1, %c0_i32_27 : i32
    %63 = arith.extui %62 : i1 to i32
    %c0_i32_28 = arith.constant 0 : i32
    %64 = arith.cmpi ne, %63, %c0_i32_28 : i32
    scf.if %64 {
      %c64_i32_29 = arith.constant 64 : i32
      %65 = arith.muli %arg0, %c64_i32_29 : i32
      %66 = tpu.iota {dimensions = array<i32: 0>} : vector<64x1xi32>
      %67 = vector.broadcast %65 : i32 to vector<64x1xi32>
      %68 = arith.addi %67, %66 : vector<64x1xi32>
      %c0_30 = arith.constant 0 : index
      %c0_31 = arith.constant 0 : index
      %69 = vector.load %arg5[%c0_30, %c0_31] : memref<64x1xf32, #tpu.memory_space<vmem>>, vector<64x1xf32>
      %c0_32 = arith.constant 0 : index
      %c0_33 = arith.constant 0 : index
      %70 = vector.load %arg6[%c0_32, %c0_33] : memref<64x1xf32, #tpu.memory_space<vmem>>, vector<64x1xf32>
      %71 = math.log %70 : vector<64x1xf32>
      %72 = arith.addf %69, %71 : vector<64x1xf32>
      %c16_i32_34 = arith.constant 16 : i32
      %73 = vector.broadcast %c16_i32_34 : i32 to vector<64x1xi32>
      %74 = arith.cmpi slt, %68, %73 : vector<64x1xi32>
      %c0_35 = arith.constant 0 : index
      %c0_36 = arith.constant 0 : index
      %75 = vector.load %arg7[%c0_35, %c0_36] : memref<64x1xf32, #tpu.memory_space<vmem>>, vector<64x1xf32>
      %76 = arith.subf %72, %75 : vector<64x1xf32>
      %cst_37 = arith.constant 0.000000e+00 : f32
      %77 = vector.broadcast %cst_37 : f32 to vector<64x1xf32>
      %78 = arith.select %74, %76, %77 : vector<64x1xi1>, vector<64x1xf32>
      %c0_38 = arith.constant 0 : index
      %c0_39 = arith.constant 0 : index
      %79 = vector.load %arg4[%c0_38, %c0_39] : memref<64x1xf32, #tpu.memory_space<vmem>>, vector<64x1xf32>
      tpu.vector_store %arg4[%c0_38, %c0_39], %78 {strides = array<i32>} : memref<64x1xf32, #tpu.memory_space<vmem>>, vector<64x1xf32>,
    } else {
    }
    return
  }
  func.func @transform_0(%arg0: i32, %arg1: i32) -> (i32, i32) {
    %c0_i32 = arith.constant 0 : i32
    %c0_i32_0 = arith.constant 0 : i32
    return %arg0, %c0_i32 : i32, i32
  }
  func.func @transform_1(%arg0: i32, %arg1: i32) -> (i32, i32) {
    %c0_i32 = arith.constant 0 : i32
    %c0_i32_0 = arith.constant 0 : i32
    %c0_i32_1 = arith.constant 0 : i32
    return %c0_i32, %c0_i32_0 : i32, i32
  }
  func.func @transform_2(%arg0: i32, %arg1: i32) -> (i32, i32) {
    %c0_i32 = arith.constant 0 : i32
    %c0_i32_0 = arith.constant 0 : i32
    return %arg0, %c0_i32 : i32, i32
  }
}

</mosaic_0001>

<bundles_post_ra>
// kernel: tpu_custom_call.1
= control target key start
LH: loop header
LB: loop body
LE: loop exit
PB: predicated region body
PF: predicated region fallthrough
CT: control target
= control target key end

     0   :  { %7 = vsyncpa [#allocation6], 0  ;;  %s1772_s0 = inlined_call_operand.hbm [shape: bf16[128,128], index: 0, kind: input, shape index: {}]   ;;  %s1773_s1 = inlined_call_operand.hbm [shape: bf16[128,128], index: 1, kind: input, shape index: {}]   ;;  %s1774_s2 = inlined_call_operand.vmem [shape: f32[128,1], index: 2, kind: output, shape index: {}]  }
   0x1   :  { %9 = vsyncpa [#allocation6 + $0x1], 0 }
   0x2   :  { %10 = vsyncpa [#allocation8], 0  ;;  %s1264_s9 = smov 0   ;;  %s1266_s10 = smov 0  }
   0x3   :  { %s1268_s11 = smov 0   ;;  %s1270_s12 = smov 0  }
   0x4   :  { %s1272_s13 = smov 0   ;;  %s1274_s14 = smov 0  }
   0x5 LB: > { %s901_s15 = sadd.s32 4294967295, %s1240_s14   ;;  %p48_p0 = scmp.ne.s32.totalorder %s1224_s10, %s1220_s9  ;;  %s1240_s14 = sphi %s1274_s14, %s16_s14   ;;  %s1236_s13 = sphi %s1272_s13, %s1794_s13   ;;  %s1232_s12 = sphi %s1270_s12, %s1793_s12   ;;  %s1228_s11 = sphi %s1268_s11, %s1792_s11   ;;  %s1224_s10 = sphi %s1266_s10, %s1791_s10   ;;  %s1220_s9 = sphi %s1264_s9, %s1790_s9  }
   0x6   : > { %p1294_p1 = scmp.eq.s32.totalorder %s901_s15, 0  ;;  %p903_p2 = scmp.ge.s32.totalorder %s1240_s14, 1 }
   0x7   : > { %p106_p3 = scmp.lt.s32.totalorder %s1240_s14, 3  ;;  %s1242_s19 = smov [#allocation7]  }
   0x8   : > { %s1779_s16 = scalar_select %p1294_p1, 1, 0 }
   0x9   : > { %p1302_p4 = por %p1294_p1, %p48_p0  ;;  %p1306_p5 = pnand %p903_p2, %p106_p3 }
   0xa   : > { %s118_s20 = sshll.u32 %s1242_s19, 4  ;;  %s28_s22 = sadd.s32 1, %s1236_s13  ;;  %s119_s20 = int_to_ptr.vmem [resolvable:$true] %s118_s20 }
   0xb   : > { %s1780_s17 = scalar_select %p1302_p4, 1, 0 }
   0xc   : > { %s1781_s18 = scalar_select %p1306_p5, 1, 0 }
   0xd   : > { %p1001_p6 = pneg %p1306_p5  ;;  %s1128_s25 = scalar_lea.hbm %s1773_s1, 1024 }
   0xe   : > { %p1129_p8 = scmp.ne.s32.totalorder %s1773_s1, %s1128_s25  ;;  %p1135_p12 = scmp.lt.u32.totalorder %s1128_s25, %s1773_s1 }
   0xf   : > { %p1314_p7 = pnand %p1001_p6, %p1294_p1 }
  0x11   : > { %p1130_p9 = pneg %p1314_p7 }
  0x13   : > { %p1131_p10 = pnand %p1130_p9, %p1129_p8 }
  0x15   : > { %p1132_p11 = pneg %p1131_p10 }
  0x17   : > { %p1137_p13 = pnand %p1135_p12, %p1132_p11 }
  0x19   : > { %1140 = shalt.err (!%p1137_p13)
}
  0x1a   : > { %s1141_s30 = scalar_lea.vmem %s119_s20, 1024  ;;  %p1149_p6 = scmp.lt.s32.totalorder %s119_s20, %s119_s20 }
  0x1b   : > { %p1142_p0 = scmp.ne.s32.totalorder %s119_s20, %s1141_s30  ;;  %p1150_p1 = scmp.lt.s32.totalorder %s1141_s30, %s1141_s30 }
  0x1d   : > { %p1144_p2 = pnand %p1142_p0, %p1130_p9  ;;  %p1151_p4 = por %p1150_p1, %p1149_p6 }
  0x1f   : > { %p1145_p3 = pneg %p1144_p2 }
  0x21   : > { %p1152_p5 = pnand %p1151_p4, %p1145_p3 }
  0x23   : > { %1155 = shalt.err (!%p1152_p5)
}
  0x24   : > { %s1243_s3 = smov 64   ;;  %s1244_s4 = smov 4  }
  0x25   : > { %1004 = dma.hbm_to_vmem [thread:$0]  (!%p1314_p7), %s1773_s1, 1024, %s119_s20, [#allocation8], %s1243_s3, %s1243_s3, %s1244_s4  }
  0x26   : > { %p30_p1 = scmp.ge.s32.totalorder %s28_s22, 2  ;;  %s35_s7 = sadd.s32 1, %s1228_s11 }
  0x27   : > { %p42_p4 = scmp.ne.s32.totalorder %s1228_s11, %s1224_s10  ;;  %p43_p5 = scmp.eq.s32.totalorder %s1240_s14, 0 }
  0x28   : > { %s1796_s22 = smov (%p30_p1, %s28_s22), 0  ;;  %p1010_p9 = scmp.lt.s32.totalorder %s1240_s14, 2 }
  0x29   : > { %p44_p8 = por %p43_p5, %p42_p4  ;;  %s32_s8 = ssub.s32 %s1236_s13, %s1796_s22 }
  0x2a   : > { %s132_s9 = sand.u32 1, %s1228_s11   ;;  %p33_p10 = scmp.eq.s32.totalorder %s32_s8, 0 }
  0x2b   : > { %s906_s15 = sshll.u32 %s132_s9, 5  ;;  %s942_s19 = sshll.u32 %s1236_s13, 9 }
  0x2c   : > { %s1350_s21 = scalar_select %p33_p10, %s1228_s11, %s35_s7  }
  0x2d   : > { %s1355_s20 = scalar_lea.hbm %s1772_s0, %s942_s19  ;;  %s136_s25 = scalar_lea.vmem [#allocation5], %s906_s15 }
  0x2e   : > { %s143_s26 = sshll.u32 %s136_s25, 4  ;;  %p1357_p7 = pnand %p1010_p9, %p44_p8  ;;  %s1361_s26 = int_to_ptr.vmem [resolvable:$true] %s143_s26 }
  0x2f   : > { %s1363_s28 = scalar_lea.sflag [#allocation6], %s132_s9  ;;  %s1156_s29 = scalar_lea.hbm %s1355_s20, 512 }
  0x30   : > { %p1157_p11 = scmp.ne.s32.totalorder %s1355_s20, %s1156_s29  ;;  %p1158_p12 = pneg %p1357_p7 }
  0x31   : > { %s1161_s6 = scalar_lea.hbm %s1772_s0, 1024  ;;  %p1162_p2 = scmp.lt.u32.totalorder %s1355_s20, %s1772_s0 }
  0x32   : > { %p1159_p13 = pnand %p1158_p12, %p1157_p11  ;;  %p1163_p3 = scmp.lt.u32.totalorder %s1161_s6, %s1156_s29 }
  0x33   : > { %p1165_p1 = scmp.lt.u32.totalorder %s1156_s29, %s1355_s20 }
  0x34   : > { %p1160_p0 = pneg %p1159_p13  ;;  %p1164_p6 = por %p1163_p3, %p1162_p2 }
  0x36   : > { %p1166_p4 = por %p1165_p1, %p1164_p6 }
  0x38   : > { %p1167_p5 = pnand %p1166_p4, %p1160_p0 }
  0x3a   : > { %1170 = shalt.err (!%p1167_p5)
}
  0x3b   : > { %s1171_s9 = scalar_lea.vmem %s1361_s26, 512  ;;  %s1245_s15 = smov [#allocation5]  }
  0x3c   : > { %p1172_p8 = scmp.ne.s32.totalorder %s1361_s26, %s1171_s9  ;;  %s1176_s19 = sshll.u32 %s1245_s15, 4  ;;  %s1177_s19 = int_to_ptr.vmem [resolvable:$false] %s1176_s19 }
  0x3d   : > { %s1178_s23 = scalar_lea.vmem %s1177_s19, 1024  ;;  %p1179_p11 = scmp.lt.s32.totalorder %s1361_s26, %s1177_s19 }
  0x3e   : > { %p1174_p9 = pnand %p1172_p8, %p1158_p12  ;;  %p1180_p13 = scmp.lt.s32.totalorder %s1178_s23, %s1171_s9 }
  0x40   : > { %p1175_p10 = pneg %p1174_p9  ;;  %p1181_p2 = por %p1180_p13, %p1179_p11 }
  0x42   : > { %p1182_p3 = pnand %p1181_p2, %p1175_p10 }
  0x44   : > { %1185 = shalt.err (!%p1182_p3)
}
  0x45   : > { %1008 = dma.hbm_to_vmem [thread:$0]  (!%p1357_p7), %s1355_s20, 512, %s1361_s26, %s1363_s28, %s1243_s3, %s1243_s3, %s1244_s4  }
  0x46   : > { %p1784_p12 = scmp.ne.s32.totalorder %s1781_s18, 0 }
  0x47   : > { %s157_s24 = sand.u32 (!%p1784_p12), 1, %s1224_s10   ;;  %p1785_p0 = scmp.ne.s32.totalorder (!%p1784_p12), %s1780_s17, 0 }
  0x48   : > { %155 = sbr.rel (%p1784_p12) target bundleno = 988 (0x3dc), region = 28  ;;  %s910_s25 = sshll.u32 (!%p1784_p12), %s157_s24, 5 }
  0x49   : > { %s158_s29 = scalar_lea.sflag (!%p1784_p12), [#allocation6], %s157_s24  ;;  %s1397_s30 = scalar_lea.vmem (!%p1784_p12), [#allocation5], %s910_s25 }
  0x4f   : > { %1211 = dma.done.wait (%p1785_p0), %s158_s29, 512  }
  0x50   : > { %1213 = vsyncadd (%p1785_p0), %s158_s29, 4294966784  ;;  %p1786_p6 = scmp.ne.s32.totalorder %s1779_s16, 0 }
  0x52   : > { %1215 = dma.done.wait (%p1786_p6), [#allocation8], 1024  }
  0x53   : > { %1217 = vsyncadd (%p1786_p6), [#allocation8], 4294966272  ;;  %s912_s18 = sshll.u32 %s1232_s12, 3  ;;  %v1068_v0 = vld [vmem:[#allocation7] sm:$0xff]   ;;  %v1069_v1 = vld [vmem:[#allocation7 + $0x8] sm:$0xff]   ;;  %s1418_s16 = sshll.u32 %s1232_s12, 6  ;;  %v390_v13 = vlaneseq }
  0x54   : > { %p188_p7 = scmp.lt.s32.totalorder %s912_s18, 15  ;;  %955 = vmatprep.subr.bf16.mxu0 %v1068_v0  ;;  %979 = vmatprep.subr.bf16.mxu1 %v1068_v0  ;;  %v1070_v2 = vld [vmem:[#allocation7 + $0x10] sm:$0xff]   ;;  %v1076_v3 = vld [vmem:[%s1397_s30] sm:$0xff]   ;;  %v1071_v5 = vld [vmem:[#allocation7 + $0x18] sm:$0xff]   ;;  %s614_s17 = sadd.s32 64, %s1418_s16  ;;  %vm198_vm0 = vcmask 7168   ;;  %v399_v16 = vstv %s1418_s16 }
  0x55   : > { %956 = vmatpush3.bf16.xpose.msra.mxu0 %v1068_v0  ;;  %987 = vmatpush3.bf16.xpose.msra.mxu1 %v1068_v0  ;;  %v1078_v4 = vld [vmem:[%s1397_s30 + $0x10] sm:$0xff]   ;;  %v1072_v6 = vld [vmem:[#allocation7 + $0x20] sm:$0xff]   ;;  %v1073_v7 = vld [vmem:[#allocation7 + $0x28] sm:$0xff]   ;;  %p616_p1 = scmp.lt.s32.totalorder %s1418_s16, 8  ;;  %s617_s27 = sadd.s32 8, %s1418_s16  ;;  %v1246_v12 = vmov -inf  }
  0x56   : > { %s1798_s18 = smov (!%p188_p7, %s912_s18), 15  ;;  %957 = vmatprep.subr.bf16.mxu0 %v1069_v1  ;;  %980 = vmatprep.subr.bf16.mxu1 %v1069_v1  ;;  %v1074_v8 = vld [vmem:[#allocation7 + $0x30] sm:$0xff]   ;;  %v1075_v9 = vld [vmem:[#allocation7 + $0x38] sm:$0xff]   ;;  %v1077_v10 = vld [vmem:[%s1397_s30 + $0x8] sm:$0xff]   ;;  %p621_p4 = scmp.lt.s32.totalorder %s614_s17, 8  ;;  %201 = vst.msk [vmem:[#allocation2 + $0x10] sm:$0xff] %vm198_vm0, %v1246_v12 }
  0x57   : > { %s913_s3 = sshll.u32 %s1798_s18, 3  ;;  %971 = vmatprep.mubr.bf16.mxu0 %v1076_v3  ;;  %975 = vmatprep.mubr.bf16.mxu1 %v1078_v4  ;;  %v1079_v11 = vld [vmem:[%s1397_s30 + $0x18] sm:$0xff]   ;;  %p927_p5 = scmp.lt.s32.totalorder %s617_s27, 128  ;;  %199 = vst.msk [vmem:[#allocation2] sm:$0xff] %vm198_vm0, %v1246_v12  ;;  %200 = vst.msk [vmem:[#allocation2 + $0x8] sm:$0xff] %vm198_vm0, %v1246_v12  ;;  %v391_v14 = vshrl.u32 %v390_v13, 7 }
  0x58   : > { %s1411_s26 = scalar_lea.vmem %s1774_s2, %s913_s3  ;;  %p627_p8 = scmp.gt.s32.totalorder %s614_s17, 8  ;;  %202 = vst.msk [vmem:[#allocation2 + $0x18] sm:$0xff] %vm198_vm0, %v1246_v12  ;;  %203 = vst.msk [vmem:[#allocation2 + $0x20] sm:$0xff] %vm198_vm0, %v1246_v12  ;;  %v1456_v19 = vand.u32 127, %v390_v13  ;;  %v1247_v48 = vmov 0   ;;  %v1248_v49 = vmov 0.0  }
  0x59   : > { %s1800_s17 = smov (!%p621_p4, %s614_s17), 8  ;;  %p619_p9 = pnand %p927_p5, %p616_p1  ;;  %204 = vst.msk [vmem:[#allocation2 + $0x28] sm:$0xff] %vm198_vm0, %v1246_v12  ;;  %205 = vst.msk [vmem:[#allocation2 + $0x30] sm:$0xff] %vm198_vm0, %v1246_v12  ;;  %v393_v15 = vadd.s32 16, %v391_v14  ;;  %v395_v17 = vadd.s32 32, %v391_v14  ;;  %v394_v20 = vadd.s32 24, %v391_v14  ;;  %v1458_v21 = vadd.s32 %v399_v16, %v391_v14  ;;  %1067 = vset.pattern.permute.xlu1 %v1247_v48  ;;  %1066 = vset.pattern.permute.xlu0 %v1247_v48 }
  0x5a   : > { %s628_s28 = sadd.s32 56, %s1418_s16  ;;  %s623_s5 = sadd.s32 8, %s1800_s17  ;;  %206 = vst.msk [vmem:[#allocation2 + $0x38] sm:$0xff] %vm198_vm0, %v1246_v12  ;;  %vm420_vm2 = vcmp.ge.s32.totalorder %v1456_v19, 16  ;;  %v396_v24 = vadd.s32 40, %v391_v14  ;;  %v392_v25 = vadd.s32 8, %v391_v14 }
  0x5b   : > { %p929_p10 = scmp.gt.s32.totalorder %s628_s28, 0  ;;  %p620_p11 = pneg %p619_p9  ;;  %v1454_v18 = vadd.s32 %v399_v16, %v393_v15  ;;  %v1460_v22 = vadd.s32 %v399_v16, %v395_v17  ;;  %v1465_v23 = vadd.s32 %v399_v16, %v394_v20  ;;  %vm412_vm3 = vcmp.eq.s32.totalorder %v1458_v21, %v1456_v19  ;;  %209 = vst.msk [vmem:[#allocation3 + $0x10] sm:$0xff] %vm198_vm0, %v1248_v49 }
  0x5c   : > { %p632_p13 = scmp.gt.s32.totalorder %s1418_s16, 8  ;;  %p928_p2 = scmp.gt.s32.totalorder %s623_s5, 0  ;;  %vm421_vm6 = vmor %vm412_vm3, %vm420_vm2  ;;  %v1477_v26 = vadd.s32 %v399_v16, %v396_v24  ;;  %v398_v27 = vadd.s32 56, %v391_v14  ;;  %v1479_v30 = vadd.s32 %v399_v16, %v392_v25  ;;  %v397_v31 = vadd.s32 48, %v391_v14  ;;  %215 = vst.msk [vmem:[#allocation4] sm:$0xff] %vm198_vm0, %v1248_v49 }
  0x5d   : > { %958 = vmatpush3.bf16.xpose.msra.mxu0 %v1069_v1  ;;  %988 = vmatpush3.bf16.xpose.msra.mxu1 %v1069_v1  ;;  %p1425_p3 = pnand %p929_p10, %p627_p8  ;;  %vm414_vm1 = vcmp.eq.s32.totalorder %v1454_v18, %v1456_v19  ;;  %vm416_vm5 = vcmp.eq.s32.totalorder %v1460_v22, %v1456_v19  ;;  %vm415_vm7 = vcmp.eq.s32.totalorder %v1465_v23, %v1456_v19  ;;  %v1548_v50 = vld [vmem:[#allocation2 + $0x10] sm:$0xff] }
  0x5e   : > { %959 = vmatprep.subr.bf16.mxu0 %v1070_v2  ;;  %981 = vmatprep.subr.bf16.mxu1 %v1070_v2  ;;  %s633_s6 = scalar_select %p632_p13, %s1418_s16, 8  ;;  %vm423_vm4 = vmor %vm414_vm1, %vm420_vm2  ;;  %vm417_vm10 = vcmp.eq.s32.totalorder %v1477_v26, %v1456_v19  ;;  %v1496_v40 = vadd.s32 %v399_v16, %v398_v27  ;;  %vm413_vm11 = vcmp.eq.s32.totalorder %v1479_v30, %v1456_v19  ;;  %v1550_v51 = vld [vmem:[#allocation2] sm:$0xff] }
  0x5f   : > { %p1430_p12 = pnand %p928_p2, %p620_p11  ;;  %p631_p0 = pneg %p1425_p3  ;;  %vm425_vm8 = vmor %vm416_vm5, %vm420_vm2  ;;  %v1502_v42 = vadd.s32 %v399_v16, %v397_v31  ;;  %216 = vst.msk [vmem:[#allocation4 + $0x8] sm:$0xff] %vm198_vm0, %v1248_v49  ;;  %v1558_v56 = vld [vmem:[#allocation2 + $0x18] sm:$0xff]  ;;  %v1565_v58 = vld [vmem:[#allocation2 + $0x20] sm:$0xff] }
  0x60   : > { %s930_s8 = sadd.s32 4294967288, %s633_s6  ;;  %vm424_vm9 = vmor %vm415_vm7, %vm420_vm2  ;;  %vm419_vm14 = vcmp.eq.s32.totalorder %v1496_v40, %v1456_v19  ;;  %217 = vst.msk [vmem:[#allocation4 + $0x10] sm:$0xff] %vm198_vm0, %v1248_v49  ;;  %v1578_v0 = vld [vmem:[#allocation2 + $0x28] sm:$0xff] }
  0x61   : > { %p931_p6 = scmp.lt.s32.totalorder %s930_s8, 128  ;;  %p626_p7 = pneg %p1430_p12  ;;  %vm426_vm12 = vmor %vm417_vm10, %vm420_vm2  ;;  %vm418_vm15 = vcmp.eq.s32.totalorder %v1502_v42, %v1456_v19  ;;  %218 = vst.msk [vmem:[#allocation4 + $0x18] sm:$0xff] %vm198_vm0, %v1248_v49 }
  0x62   : > { %vm422_vm13 = vmor %vm413_vm11, %vm420_vm2  ;;  %219 = vst.msk [vmem:[#allocation4 + $0x20] sm:$0xff] %vm198_vm0, %v1248_v49 }
  0x63   : > { %p636_p1 = pnand %p931_p6, %p631_p0  ;;  %vm428_vm1 = vmor %vm419_vm14, %vm420_vm2  ;;  %220 = vst.msk [vmem:[#allocation4 + $0x28] sm:$0xff] %vm198_vm0, %v1248_v49 }
  0x64   : > { %vm427_vm3 = vmor %vm418_vm15, %vm420_vm2  ;;  %221 = vst.msk [vmem:[#allocation4 + $0x30] sm:$0xff] %vm198_vm0, %v1248_v49 }
  0x65   : > { %960 = vmatpush3.bf16.xpose.msra.mxu0 %v1070_v2  ;;  %989 = vmatpush3.bf16.xpose.msra.mxu1 %v1070_v2  ;;  %p637_p4 = pneg %p636_p1  ;;  %222 = vst.msk [vmem:[#allocation4 + $0x38] sm:$0xff] %vm198_vm0, %v1248_v49  ;;  %207 = vst.msk [vmem:[#allocation3] sm:$0xff] %vm198_vm0, %v1248_v49  ;;  %v1584_v2 = vld [vmem:[#allocation2 + $0x8] sm:$0xff] }
  0x66   : > { %961 = vmatprep.subr.bf16.mxu0 %v1071_v5  ;;  %982 = vmatprep.subr.bf16.mxu1 %v1071_v5  ;;  %208 = vst.msk [vmem:[#allocation3 + $0x8] sm:$0xff] %vm198_vm0, %v1248_v49  ;;  %210 = vst.msk [vmem:[#allocation3 + $0x18] sm:$0xff] %vm198_vm0, %v1248_v49 }
  0x67   : > { %p1449_p5 = por %p637_p4, %p626_p7  ;;  %211 = vst.msk [vmem:[#allocation3 + $0x20] sm:$0xff] %vm198_vm0, %v1248_v49  ;;  %212 = vst.msk [vmem:[#allocation3 + $0x28] sm:$0xff] %vm198_vm0, %v1248_v49 }
  0x68   : > { %213 = vst.msk [vmem:[#allocation3 + $0x30] sm:$0xff] %vm198_vm0, %v1248_v49  ;;  %214 = vst.msk [vmem:[#allocation3 + $0x38] sm:$0xff] %vm198_vm0, %v1248_v49  ;;  %vm644_vm2 = vcmp.lt.s32.totalorder (%p1449_p5), %v1454_v18, 8  ;;  %vm645_vm5 = vcmp.lt.s32.totalorder (%p1449_p5), %v1465_v23, 8  ;;  %vm648_vm15 = vcmp.lt.s32.totalorder (%p1449_p5), %v1502_v42, 8 }
  0x6d   : > { %962 = vmatpush3.bf16.xpose.msra.mxu0 %v1071_v5  ;;  %990 = vmatpush3.bf16.xpose.msra.mxu1 %v1071_v5 }
  0x6e   : > { %963 = vmatprep.subr.bf16.mxu0 %v1072_v6  ;;  %983 = vmatprep.subr.bf16.mxu1 %v1072_v6 }
  0x75   : > { %964 = vmatpush3.bf16.xpose.msra.mxu0 %v1072_v6  ;;  %991 = vmatpush3.bf16.xpose.msra.mxu1 %v1072_v6 }
  0x76   : > { %965 = vmatprep.subr.bf16.mxu0 %v1073_v7  ;;  %984 = vmatprep.subr.bf16.mxu1 %v1073_v7 }
  0x7d   : > { %966 = vmatpush3.bf16.xpose.msra.mxu0 %v1073_v7  ;;  %992 = vmatpush3.bf16.xpose.msra.mxu1 %v1073_v7 }
  0x7e   : > { %967 = vmatprep.subr.bf16.mxu0 %v1074_v8  ;;  %985 = vmatprep.subr.bf16.mxu1 %v1074_v8 }
  0x85   : > { %968 = vmatpush3.bf16.xpose.msra.mxu0 %v1074_v8  ;;  %993 = vmatpush3.bf16.xpose.msra.mxu1 %v1074_v8  ;;  %v1596_v8 = vld [vmem:[#allocation2 + $0x38] sm:$0xff] }
  0x86   : > { %969 = vmatprep.subr.bf16.mxu0 %v1075_v9  ;;  %986 = vmatprep.subr.bf16.mxu1 %v1075_v9 }
  0x8d   : > { %970 = vmatpush3.bf16.xpose.msra.mxu0 %v1075_v9  ;;  %994 = vmatpush3.bf16.xpose.msra.mxu1 %v1075_v9 }
  0x94   : > { %972 = vmatmul.mubr.bf16.vlgmr.msra.gmra.mrb[0].mxu0 %v1077_v10  ;;  %976 = vmatmul.mubr.bf16.vlgmr.msra.gmra.mrb[0].mxu1 %v1079_v11  ;;  %v1602_v10 = vld [vmem:[#allocation2 + $0x30] sm:$0xff] }
 0x167   : > { %v973_v28 = vpop.f32.mrb[0].mxu0  ;;  %v977_v29 = vpop.f32.mrb[0].mxu1 }
 0x168   : > { %v358_v32 = vpop.f32.mrb[1].mxu0  ;;  %v374_v33 = vpop.f32.mrb[1].mxu1  ;;  %v1481_v34 = vsel %vm423_vm4, -1000000.0, %v973_v28  ;;  %v1529_v47 = vsel %vm427_vm3, -1000000.0, %v977_v29 }
 0x169   : > { %449 = vmax.xlane.f32.xlu1 %v1481_v34  ;;  %v974_v35 = vpop.f32.mrb[2].mxu0  ;;  %v978_v36 = vpop.f32.mrb[2].mxu1  ;;  %v1486_v37 = vsel %vm421_vm6, -1000000.0, %v358_v32  ;;  %v1498_v41 = vsel %vm425_vm8, -1000000.0, %v374_v33 }
 0x16a   : > { %445 = vmax.xlane.f32.xlu0 %v1486_v37  ;;  %v361_v38 = vpop.f32.mrb[3].mxu0  ;;  %v377_v39 = vpop.f32.mrb[3].mxu1  ;;  %v1504_v43 = vsel %vm424_vm9, -1000000.0, %v974_v35  ;;  %v1526_v46 = vsel %vm428_vm1, -1000000.0, %v978_v36 }
 0x16b   : > { %v1516_v44 = vsel %vm426_vm12, -1000000.0, %v377_v39  ;;  %v1519_v45 = vsel %vm422_vm13, -1000000.0, %v361_v38  ;;  %vm642_vm4 = vcmp.lt.s32.totalorder (%p1449_p5), %v1458_v21, 8  ;;  %vm643_vm6 = vcmp.lt.s32.totalorder (%p1449_p5), %v1479_v30, 8 }
 0x16c   : > { %vm647_vm8 = vcmp.lt.s32.totalorder (%p1449_p5), %v1477_v26, 8  ;;  %vm646_vm12 = vcmp.lt.s32.totalorder (%p1449_p5), %v1460_v22, 8  ;;  %vm649_vm13 = vcmp.lt.s32.totalorder (%p1449_p5), %v1496_v40, 8 }
 0x16d   : > { %451 = vmax.xlane.f32.xlu1 %v1504_v43 }
 0x16e   : > { %453 = vmax.xlane.f32.xlu0 %v1498_v41 }
 0x171   : > { %455 = vmax.xlane.f32.xlu1 %v1516_v44 }
 0x172   : > { %447 = vmax.xlane.f32.xlu0 %v1519_v45 }
 0x175   : > { %459 = vmax.xlane.f32.xlu1 %v1526_v46 }
 0x176   : > { %457 = vmax.xlane.f32.xlu0 %v1529_v47 }
 0x1f6   : > { %v450_v52 = vpop.xlane.xlu1 %449 }
 0x1f7   : > { %v1553_v53 = vmax.f32 %v1548_v50, %v450_v52  ;;  %v446_v54 = vpop.xlane.xlu0 %445 }
 0x1f8   : > { %v1556_v55 = vmax.f32 %v1550_v51, %v446_v54 }
 0x1f9   : > { %v471_v57 = vsub.f32 %v1548_v50, %v1553_v53  ;;  %608 = vst.msk [vmem:[#allocation2 + $0x10] sm:$0xff] %vm198_vm0, %v1553_v53  ;;  %505 = vperm.xlu1 %1067, %v1553_v53  }
 0x1fa   : > { %v469_v59 = vsub.f32 %v1550_v51, %v1556_v55  ;;  %606 = vst.msk [vmem:[#allocation2] sm:$0xff] %vm198_vm0, %v1556_v55  ;;  %v452_v60 = vpop.xlane.xlu1 %451  ;;  %495 = vperm.xlu0 %1066, %v1556_v55  }
 0x1fb   : > { %v1573_v61 = vmax.f32 %v1558_v56, %v452_v60  ;;  %v454_v62 = vpop.xlane.xlu0 %453 }
 0x1fc   : > { %v1576_v63 = vmax.f32 %v1565_v58, %v454_v62 }
 0x1fd   : > { %v472_v1 = vsub.f32 %v1558_v56, %v1573_v61  ;;  %609 = vst.msk [vmem:[#allocation2 + $0x18] sm:$0xff] %vm198_vm0, %v1573_v61 }
 0x1fe   : > { %v473_v3 = vsub.f32 %v1565_v58, %v1576_v63  ;;  %610 = vst.msk [vmem:[#allocation2 + $0x20] sm:$0xff] %vm198_vm0, %v1576_v63  ;;  %v456_v4 = vpop.xlane.xlu1 %455 }
 0x1ff   : > { %v1591_v5 = vmax.f32 %v1578_v0, %v456_v4  ;;  %v448_v6 = vpop.xlane.xlu0 %447  ;;  %v483_v51 = vmul.f32 1.442695, %v472_v1 }
 0x200   : > { %v1594_v7 = vmax.f32 %v1584_v2, %v448_v6 }
 0x201   : > { %v474_v9 = vsub.f32 %v1578_v0, %v1591_v5  ;;  %611 = vst.msk [vmem:[#allocation2 + $0x28] sm:$0xff] %vm198_vm0, %v1591_v5 }
 0x202   : > { %v470_v11 = vsub.f32 %v1584_v2, %v1594_v7  ;;  %607 = vst.msk [vmem:[#allocation2 + $0x8] sm:$0xff] %vm198_vm0, %v1594_v7  ;;  %v460_v12 = vpop.xlane.xlu1 %459 }
 0x203   : > { %v1609_v13 = vmax.f32 %v1596_v8, %v460_v12  ;;  %v458_v14 = vpop.xlane.xlu0 %457 }
 0x204   : > { %v1612_v15 = vmax.f32 %v1602_v10, %v458_v14  ;;  %v479_v55 = vmul.f32 1.442695, %v470_v11 }
 0x205   : > { %v476_v16 = vsub.f32 %v1596_v8, %v1609_v13  ;;  %613 = vst.msk [vmem:[#allocation2 + $0x38] sm:$0xff] %vm198_vm0, %v1609_v13 }
 0x206   : > { %v475_v17 = vsub.f32 %v1602_v10, %v1612_v15  ;;  %612 = vst.msk [vmem:[#allocation2 + $0x30] sm:$0xff] %vm198_vm0, %v1612_v15  ;;  %525 = vperm.xlu1 %1067, %v1612_v15   ;;  %v558_v10 = vld [vmem:[#allocation3 + $0x8] sm:$0xff] }
 0x208   : > { %v489_v56 = vmul.f32 1.442695, %v475_v17 }
 0x20a   : > { %515 = vperm.xlu1 %1067, %v1576_v63  }
 0x20e   : > { %510 = vperm.xlu1 %1067, %v1573_v61   ;;  %v491_v61 = vmul.f32 1.442695, %v476_v16  ;;  %v562_v16 = vld [vmem:[#allocation3 + $0x28] sm:$0xff] }
 0x212   : > { %500 = vperm.xlu1 %1067, %v1594_v7  }
 0x216   : > { %520 = vperm.xlu1 %1067, %v1591_v5  }
 0x21a   : > { %530 = vperm.xlu1 %1067, %v1609_v13  }
 0x278   : > { %v506_v20 = vpop.permute.xlu1 %505 }
 0x279   : > { %v535_v24 = vsub.f32 %v1481_v34, %v506_v20  ;;  %v496_v25 = vpop.permute.xlu0 %495 }
 0x27a   : > { %v533_v27 = vsub.f32 %v1486_v37, %v496_v25 }
 0x27b   : > { %v545_v28 = vmul.f32 1.442695, %v535_v24 }
 0x27c   : > { %v541_v29 = vmul.f32 1.442695, %v533_v27 }
 0x27d   : > { %1080 = vpow2.f32 %v545_v28 }
 0x27e   : > { %1082 = vpow2.f32 %v541_v29 }
 0x285   : > { %v526_v31 = vpop.permute.xlu1 %525 }
 0x286   : > { %v539_v52 = vsub.f32 %v1529_v47, %v526_v31 }
 0x287   : > { %v1081_v32 = vpop.eup %1080 }
 0x288   : > { %v1083_v33 = vpop.eup %1082  ;;  %577 = vadd.xlane.f32.xlu0 %v1081_v32  ;;  %v553_v4 = vmul.f32 1.442695, %v539_v52  ;;  %v485_v52 = vmul.f32 1.442695, %v473_v3  ;;  %v560_v3 = vld [vmem:[#allocation3 + $0x18] sm:$0xff] }
 0x289   : > { %v516_v35 = vpop.permute.xlu1 %515  ;;  %573 = vadd.xlane.f32.xlu1 %v1083_v33 }
 0x28a   : > { %v537_v36 = vsub.f32 %v1498_v41, %v516_v35  ;;  %v481_v35 = vmul.f32 1.442695, %v471_v57  ;;  %v487_v57 = vmul.f32 1.442695, %v474_v9 }
 0x28c   : > { %v549_v38 = vmul.f32 1.442695, %v537_v36  ;;  %v477_v36 = vmul.f32 1.442695, %v469_v59  ;;  %v561_v59 = vld [vmem:[#allocation3 + $0x20] sm:$0xff] }
 0x28d   : > { %v511_v39 = vpop.permute.xlu1 %510 }
 0x28e   : > { %1084 = vpow2.f32 %v549_v38  ;;  %v536_v48 = vsub.f32 %v1504_v43, %v511_v39  ;;  %v559_v39 = vld [vmem:[#allocation3 + $0x10] sm:$0xff] }
 0x290   : > { %v547_v49 = vmul.f32 1.442695, %v536_v48 }
 0x291   : > { %v501_v54 = vpop.permute.xlu1 %500 }
 0x292   : > { %1086 = vpow2.f32 %v547_v49  ;;  %v534_v60 = vsub.f32 %v1519_v45, %v501_v54  ;;  %v557_v49 = vld [vmem:[#allocation3] sm:$0xff] }
 0x294   : > { %v543_v62 = vmul.f32 1.442695, %v534_v60 }
 0x295   : > { %v521_v6 = vpop.permute.xlu1 %520 }
 0x296   : > { %1088 = vpow2.f32 %v543_v62  ;;  %v538_v12 = vsub.f32 %v1516_v44, %v521_v6  ;;  %v563_v6 = vld [vmem:[#allocation3 + $0x30] sm:$0xff] }
 0x297   : > { %1090 = vpow2.f32 %v553_v4 }
 0x298   : > { %v1085_v14 = vpop.eup %1084  ;;  %v551_v20 = vmul.f32 1.442695, %v538_v12 }
 0x299   : > { %v531_v24 = vpop.permute.xlu1 %530  ;;  %581 = vadd.xlane.f32.xlu0 %v1085_v14 }
 0x29a   : > { %1092 = vpow2.f32 %v551_v20  ;;  %v540_v25 = vsub.f32 %v1526_v46, %v531_v24 }
 0x29c   : > { %v1087_v27 = vpop.eup %1086  ;;  %v555_v28 = vmul.f32 1.442695, %v540_v25 }
 0x29d   : > { %579 = vadd.xlane.f32.xlu1 %v1087_v27 }
 0x29e   : > { %1094 = vpow2.f32 %v555_v28  ;;  %v564_v28 = vld [vmem:[#allocation3 + $0x38] sm:$0xff] }
 0x29f   : > { %1096 = vpow2.f32 %v481_v35 }
 0x2a0   : > { %v1089_v29 = vpop.eup %1088  ;;  %1098 = vpow2.f32 %v477_v36  ;;  %v652_v36 = vadd.s32 (%p1449_p5), 8, %v1454_v18 }
 0x2a1   : > { %575 = vadd.xlane.f32.xlu0 %v1089_v29  ;;  %v1091_v31 = vpop.eup %1090  ;;  %1100 = vpow2.f32 %v485_v52 }
 0x2a2   : > { %1102 = vpow2.f32 %v483_v51  ;;  %v655_v51 = vadd.s32 (%p1449_p5), 8, %v1477_v26 }
 0x2a3   : > { %1104 = vpow2.f32 %v479_v55 }
 0x2a4   : > { %v1093_v32 = vpop.eup %1092  ;;  %1106 = vpow2.f32 %v487_v57 }
 0x2a5   : > { %585 = vadd.xlane.f32.xlu0 %v1091_v31  ;;  %583 = vadd.xlane.f32.xlu1 %v1093_v32  ;;  %1108 = vpow2.f32 %v489_v56  ;;  %v937_v56 = vadd.s32 (%p1449_p5), 4294967288, %v1477_v26 }
 0x2a6   : > { %1110 = vpow2.f32 %v491_v61 }
 0x2a7   : > { %v671_v61 = vsel (%p1449_p5), %vm647_vm8, %v655_v51, %v937_v56 }
 0x2a8   : > { %v1095_v33 = vpop.eup %1094  ;;  %vm679_vm14 = vcmp.eq.s32.totalorder (%p1449_p5), %v671_v61, %v1456_v19 }
 0x2a9   : > { %587 = vadd.xlane.f32.xlu1 %v1095_v33  ;;  %v1097_v38 = vpop.eup %1096 }
 0x2aa   : > { %v1099_v48 = vpop.eup %1098  ;;  %v567_v54 = vmul.f32 %v1097_v38, %v559_v39  ;;  %v934_v38 = vadd.s32 (%p1449_p5), 4294967288, %v1454_v18  ;;  %v650_v39 = vadd.s32 (%p1449_p5), 8, %v1458_v21 }
 0x2ab   : > { %v565_v62 = vmul.f32 %v1099_v48, %v557_v49  ;;  %v1101_v58 = vpop.eup %1100  ;;  %v932_v48 = vadd.s32 (%p1449_p5), 4294967288, %v1458_v21  ;;  %v653_v49 = vadd.s32 (%p1449_p5), 8, %v1465_v23 }
 0x2ac   : > { %v569_v63 = vmul.f32 %v1101_v58, %v561_v59  ;;  %v1103_v1 = vpop.eup %1102  ;;  %v668_v52 = vsel (%p1449_p5), %vm644_vm2, %v652_v36, %v934_v38 }
 0x2ad   : > { %v568_v0 = vmul.f32 %v1103_v1, %v560_v3  ;;  %v1105_v5 = vpop.eup %1104  ;;  %vm676_vm7 = vcmp.eq.s32.totalorder (%p1449_p5), %v668_v52, %v1456_v19  ;;  %v695_v3 = vsel (%p1449_p5), %vm679_vm14, %v1516_v44, 0.0  ;;  %v682_v44 = vld [vmem:[#allocation4] sm:$0xff] (%p1449_p5) }
 0x2ae   : > { %v1107_v15 = vpop.eup %1106  ;;  %v566_v17 = vmul.f32 %v1105_v5, %v558_v10 }
 0x2af   : > { %v1109_v8 = vpop.eup %1108  ;;  %v570_v14 = vmul.f32 %v1107_v15, %v562_v16  ;;  %v683_v16 = vld [vmem:[#allocation4 + $0x8] sm:$0xff] (%p1449_p5) }
 0x2b0   : > { %v571_v20 = vmul.f32 %v1109_v8, %v563_v6  ;;  %v1111_v24 = vpop.eup %1110 }
 0x2b1   : > { %v572_v32 = vmul.f32 %v1111_v24, %v564_v28  ;;  %v689_v28 = vld [vmem:[#allocation4 + $0x38] sm:$0xff] (%p1449_p5) }
 0x315   : > { %v578_v60 = vpop.xlane.xlu0 %577 }
 0x316   : > { %v591_v4 = vadd.f32 %v578_v60, %v567_v54  ;;  %v574_v50 = vpop.xlane.xlu1 %573  ;;  %v935_v54 = vadd.s32 (%p1449_p5), 4294967288, %v1465_v23  ;;  %v651_v60 = vadd.s32 (%p1449_p5), 8, %v1479_v30 }
 0x317   : > { %v589_v53 = vadd.f32 %v574_v50, %v565_v62  ;;  %v666_v62 = vsel (%p1449_p5), %vm642_vm4, %v650_v39, %v932_v48  ;;  %v692_v50 = vsel (%p1449_p5), %vm676_vm7, %v1481_v34, 0.0  ;;  %v654_v34 = vadd.s32 (%p1449_p5), 8, %v1460_v22 }
 0x318   : > { %600 = vst.msk [vmem:[#allocation3 + $0x10] sm:$0xff] %vm198_vm0, %v591_v4  ;;  %v933_v4 = vadd.s32 (%p1449_p5), 4294967288, %v1479_v30  ;;  %vm674_vm9 = vcmp.eq.s32.totalorder (%p1449_p5), %v666_v62, %v1456_v19  ;;  %702 = vadd.xlane.f32.xlu1 (%p1449_p5), %v692_v50 }
 0x319   : > { %598 = vst.msk [vmem:[#allocation3] sm:$0xff] %vm198_vm0, %v589_v53  ;;  %v669_v53 = vsel (%p1449_p5), %vm645_vm5, %v653_v49, %v935_v54  ;;  %v690_v55 = vsel (%p1449_p5), %vm674_vm9, %v1486_v37, 0.0  ;;  %v936_v37 = vadd.s32 (%p1449_p5), 4294967288, %v1460_v22 }
 0x31a   : > { %vm677_vm10 = vcmp.eq.s32.totalorder (%p1449_p5), %v669_v53, %v1456_v19  ;;  %v667_v57 = vsel (%p1449_p5), %vm643_vm6, %v651_v60, %v933_v4  ;;  %698 = vadd.xlane.f32.xlu0 (%p1449_p5), %v690_v55 }
 0x31b   : > { %v693_v58 = vsel (%p1449_p5), %vm677_vm10, %v1504_v43, 0.0  ;;  %vm675_vm11 = vcmp.eq.s32.totalorder (%p1449_p5), %v667_v57, %v1456_v19  ;;  %v939_v43 = vadd.s32 (%p1449_p5), 4294967288, %v1496_v40  ;;  %v670_v1 = vsel (%p1449_p5), %vm646_vm12, %v654_v34, %v936_v37 }
 0x31c   : > { %v691_v59 = vsel (%p1449_p5), %vm675_vm11, %v1519_v45, 0.0  ;;  %704 = vadd.xlane.f32.xlu1 (%p1449_p5), %v693_v58  ;;  %v938_v45 = vadd.s32 (%p1449_p5), 4294967288, %v1502_v42  ;;  %vm678_vm1 = vcmp.eq.s32.totalorder (%p1449_p5), %v670_v1, %v1456_v19 }
 0x31e   : > { %700 = vadd.xlane.f32.xlu0 (%p1449_p5), %v691_v59 }
 0x320   : > { %708 = vadd.xlane.f32.xlu1 (%p1449_p5), %v695_v3 }
 0x326   : > { %v582_v2 = vpop.xlane.xlu0 %581 }
 0x327   : > { %v593_v7 = vadd.f32 %v582_v2, %v569_v63  ;;  %v657_v63 = vadd.s32 (%p1449_p5), 8, %v1496_v40  ;;  %v656_v2 = vadd.s32 (%p1449_p5), 8, %v1502_v42 }
 0x329   : > { %602 = vst.msk [vmem:[#allocation3 + $0x20] sm:$0xff] %vm198_vm0, %v593_v7  ;;  %v673_v7 = vsel (%p1449_p5), %vm649_vm13, %v657_v63, %v939_v43  ;;  %v672_v5 = vsel (%p1449_p5), %vm648_vm15, %v656_v2, %v938_v45 }
 0x32a   : > { %v580_v9 = vpop.xlane.xlu1 %579  ;;  %vm681_vm3 = vcmp.eq.s32.totalorder (%p1449_p5), %v673_v7, %v1456_v19  ;;  %vm680_vm2 = vcmp.eq.s32.totalorder (%p1449_p5), %v672_v5, %v1456_v19 }
 0x32b   : > { %v592_v11 = vadd.f32 %v580_v9, %v568_v0  ;;  %v694_v0 = vsel (%p1449_p5), %vm678_vm1, %v1498_v41, 0.0  ;;  %v697_v9 = vsel (%p1449_p5), %vm681_vm3, %v1526_v46, 0.0  ;;  %v696_v10 = vsel (%p1449_p5), %vm680_vm2, %v1529_v47, 0.0  ;;  %v685_v41 = vld [vmem:[#allocation4 + $0x18] sm:$0xff] (%p1449_p5)  ;;  %v686_v47 = vld [vmem:[#allocation4 + $0x20] sm:$0xff] (%p1449_p5) }
 0x32c   : > { %706 = vadd.xlane.f32.xlu0 (%p1449_p5), %v694_v0  ;;  %712 = vadd.xlane.f32.xlu1 (%p1449_p5), %v697_v9 }
 0x32d   : > { %601 = vst.msk [vmem:[#allocation3 + $0x18] sm:$0xff] %vm198_vm0, %v592_v11  ;;  %v684_v11 = vld [vmem:[#allocation4 + $0x10] sm:$0xff] (%p1449_p5) }
 0x32e   : > { %v576_v13 = vpop.xlane.xlu0 %575 }
 0x32f   : > { %v590_v12 = vadd.f32 %v576_v13, %v566_v17 }
 0x330   : > { %710 = vadd.xlane.f32.xlu0 (%p1449_p5), %v696_v10 }
 0x331   : > { %599 = vst.msk [vmem:[#allocation3 + $0x8] sm:$0xff] %vm198_vm0, %v590_v12 }
 0x332   : > { %v584_v25 = vpop.xlane.xlu1 %583  ;;  %v586_v27 = vpop.xlane.xlu0 %585 }
 0x333   : > { %v594_v29 = vadd.f32 %v584_v25, %v570_v14  ;;  %v595_v31 = vadd.f32 %v586_v27, %v571_v20  ;;  %641 = sbr.rel (!%p1449_p5) target bundleno = 961 (0x3c1), region = 44  ;;  %v687_v14 = vld [vmem:[#allocation4 + $0x28] sm:$0xff] (%p1449_p5) }
 0x335   : > { %603 = vst.msk [vmem:[#allocation3 + $0x28] sm:$0xff] %vm198_vm0, %v594_v29  ;;  %604 = vst.msk [vmem:[#allocation3 + $0x30] sm:$0xff] %vm198_vm0, %v595_v31  ;;  %v688_v29 = vld [vmem:[#allocation4 + $0x30] sm:$0xff] (%p1449_p5) }
 0x336   : > { %v588_v33 = vpop.xlane.xlu1 %587 }
 0x337   : > { %v596_v35 = vadd.f32 %v588_v33, %v572_v32 }
 0x339   : > { %605 = vst.msk [vmem:[#allocation3 + $0x38] sm:$0xff] %vm198_vm0, %v596_v35 }
 0x3a5   : > { %v703_v15 = vpop.xlane.xlu1 %702 }
 0x3a6   : > { %v716_v17 = vadd.f32 %v703_v15, %v684_v11 }
 0x3a7   : > { %v699_v8 = vpop.xlane.xlu0 %698 }
 0x3a8   : > { %v714_v13 = vadd.f32 %v699_v8, %v682_v44  ;;  %724 = vst.msk [vmem:[#allocation4 + $0x10] sm:$0xff] %vm198_vm0, %v716_v17 }
 0x3a9   : > { %v705_v19 = vpop.xlane.xlu1 %704 }
 0x3aa   : > { %722 = vst.msk [vmem:[#allocation4] sm:$0xff] %vm198_vm0, %v714_v13  ;;  %v717_v6 = vadd.f32 %v705_v19, %v685_v41 }
 0x3ab   : > { %v701_v12 = vpop.xlane.xlu0 %700 }
 0x3ac   : > { %v715_v46 = vadd.f32 %v701_v12, %v683_v16  ;;  %725 = vst.msk [vmem:[#allocation4 + $0x18] sm:$0xff] %vm198_vm0, %v717_v6 }
 0x3ad   : > { %v709_v20 = vpop.xlane.xlu1 %708 }
 0x3ae   : > { %723 = vst.msk [vmem:[#allocation4 + $0x8] sm:$0xff] %vm198_vm0, %v715_v46  ;;  %v719_v24 = vadd.f32 %v709_v20, %v687_v14 }
 0x3b0   : > { %727 = vst.msk [vmem:[#allocation4 + $0x28] sm:$0xff] %vm198_vm0, %v719_v24 }
 0x3b9   : > { %v707_v25 = vpop.xlane.xlu0 %706  ;;  %v713_v31 = vpop.xlane.xlu1 %712 }
 0x3ba   : > { %v718_v27 = vadd.f32 %v707_v25, %v686_v47  ;;  %v721_v32 = vadd.f32 %v713_v31, %v689_v28 }
 0x3bc   : > { %726 = vst.msk [vmem:[#allocation4 + $0x20] sm:$0xff] %vm198_vm0, %v718_v27  ;;  %729 = vst.msk [vmem:[#allocation4 + $0x38] sm:$0xff] %vm198_vm0, %v721_v32 }
 0x3bd   : > { %v711_v33 = vpop.xlane.xlu0 %710 }
 0x3be   : > { %v720_v35 = vadd.f32 %v711_v33, %v688_v29 }
 0x3c0   : > { %728 = vst.msk [vmem:[#allocation4 + $0x30] sm:$0xff] %vm198_vm0, %v720_v35 }
 0x3c1 PF: > { %v741_v36 = vld [vmem:[#allocation3] sm:$0xff]  ;;  %v742_v38 = vld [vmem:[#allocation3 + $0x8] sm:$0xff]  ;;  %v743_v39 = vld [vmem:[#allocation3 + $0x10] sm:$0xff]  ;;  %vm773_vm4 = vcmp.lt.s32.totalorder %v1458_v21, 16  ;;  %vm774_vm5 = vcmp.lt.s32.totalorder %v1479_v30, 16  ;;  %vm775_vm6 = vcmp.lt.s32.totalorder %v1454_v18, 16 }
 0x3c2   : > { %1112 = vlog2.f32 %v741_v36  ;;  %v744_v48 = vld [vmem:[#allocation3 + $0x18] sm:$0xff]  ;;  %v745_v49 = vld [vmem:[#allocation3 + $0x20] sm:$0xff]  ;;  %v734_v51 = vld [vmem:[#allocation2 + $0x8] sm:$0xff]  ;;  %vm776_vm7 = vcmp.lt.s32.totalorder %v1465_v23, 16  ;;  %vm777_vm8 = vcmp.lt.s32.totalorder %v1460_v22, 16  ;;  %vm778_vm9 = vcmp.lt.s32.totalorder %v1477_v26, 16 }
 0x3c3   : > { %1114 = vlog2.f32 %v742_v38  ;;  %v746_v52 = vld [vmem:[#allocation3 + $0x28] sm:$0xff]  ;;  %v747_v54 = vld [vmem:[#allocation3 + $0x30] sm:$0xff]  ;;  %v733_v4 = vld [vmem:[#allocation2] sm:$0xff]  ;;  %vm779_vm10 = vcmp.lt.s32.totalorder %v1502_v42, 16  ;;  %vm780_vm11 = vcmp.lt.s32.totalorder %v1496_v40, 16 }
 0x3c4   : > { %1116 = vlog2.f32 %v743_v39  ;;  %v781_v57 = vld [vmem:[#allocation4] sm:$0xff]  ;;  %v735_v58 = vld [vmem:[#allocation2 + $0x10] sm:$0xff]  ;;  %v782_v61 = vld [vmem:[#allocation4 + $0x8] sm:$0xff] }
 0x3c5   : > { %1118 = vlog2.f32 %v744_v48  ;;  %v736_v63 = vld [vmem:[#allocation2 + $0x18] sm:$0xff]  ;;  %v783_v2 = vld [vmem:[#allocation4 + $0x10] sm:$0xff]  ;;  %v737_v3 = vld [vmem:[#allocation2 + $0x20] sm:$0xff] }
 0x3c6   : > { %1120 = vlog2.f32 %v745_v49  ;;  %v784_v9 = vld [vmem:[#allocation4 + $0x18] sm:$0xff]  ;;  %v738_v11 = vld [vmem:[#allocation2 + $0x28] sm:$0xff]  ;;  %v785_v8 = vld [vmem:[#allocation4 + $0x20] sm:$0xff] }
 0x3c7   : > { %1122 = vlog2.f32 %v746_v52  ;;  %v748_v60 = vld [vmem:[#allocation3 + $0x38] sm:$0xff]  ;;  %v739_v41 = vld [vmem:[#allocation2 + $0x30] sm:$0xff]  ;;  %v786_v46 = vld [vmem:[#allocation4 + $0x28] sm:$0xff] }
 0x3c8   : > { %1124 = vlog2.f32 %v747_v54  ;;  %v740_v47 = vld [vmem:[#allocation2 + $0x38] sm:$0xff]  ;;  %v787_v27 = vld [vmem:[#allocation4 + $0x30] sm:$0xff] }
 0x3c9   : > { %1126 = vlog2.f32 %v748_v60  ;;  %v788_v32 = vld [vmem:[#allocation4 + $0x38] sm:$0xff] }
 0x3cc   : > { %v1113_v62 = vpop.eup %1112 }
 0x3cd   : > { %v1115_v50 = vpop.eup %1114  ;;  %v750_v53 = vmul.f32 0.6931472, %v1113_v62 }
 0x3ce   : > { %v1117_v55 = vpop.eup %1116  ;;  %v752_v56 = vmul.f32 0.6931472, %v1115_v50 }
 0x3cf   : > { %v1119_v34 = vpop.eup %1118  ;;  %v765_v59 = vadd.f32 %v750_v53, %v733_v4  ;;  %v754_v37 = vmul.f32 0.6931472, %v1117_v55 }
 0x3d0   : > { %v1121_v43 = vpop.eup %1120  ;;  %v766_v1 = vadd.f32 %v752_v56, %v734_v51  ;;  %v756_v45 = vmul.f32 0.6931472, %v1119_v34 }
 0x3d1   : > { %v1123_v7 = vpop.eup %1122  ;;  %v789_v0 = vsub.f32 %v765_v59, %v781_v57  ;;  %v767_v5 = vadd.f32 %v754_v37, %v735_v58  ;;  %v758_v10 = vmul.f32 0.6931472, %v1121_v43 }
 0x3d2   : > { %v1125_v44 = vpop.eup %1124  ;;  %v790_v15 = vsub.f32 %v766_v1, %v782_v61  ;;  %v768_v17 = vadd.f32 %v756_v45, %v736_v63  ;;  %v760_v13 = vmul.f32 0.6931472, %v1123_v7 }
 0x3d3   : > { %v1127_v16 = vpop.eup %1126  ;;  %v797_v19 = vsel %vm773_vm4, %v789_v0, 0.0  ;;  %v791_v6 = vsub.f32 %v767_v5, %v783_v2  ;;  %v769_v12 = vadd.f32 %v758_v10, %v737_v3  ;;  %v762_v14 = vmul.f32 0.6931472, %v1125_v44 }
 0x3d4   : > { %805 = vst.msk [vmem:[%s1411_s26] sm:$0xff] %vm198_vm0, %v797_v19  ;;  %v798_v20 = vsel %vm774_vm5, %v790_v15, 0.0  ;;  %v792_v24 = vsub.f32 %v768_v17, %v784_v9  ;;  %v770_v25 = vadd.f32 %v760_v13, %v738_v11  ;;  %v764_v28 = vmul.f32 0.6931472, %v1127_v16 }
 0x3d5   : > { %806 = vst.msk [vmem:[%s1411_s26 + $0x8] sm:$0xff] %vm198_vm0, %v798_v20  ;;  %v799_v21 = vsel %vm775_vm6, %v791_v6, 0.0  ;;  %v793_v29 = vsub.f32 %v769_v12, %v785_v8  ;;  %v771_v31 = vadd.f32 %v762_v14, %v739_v41 }
 0x3d6   : > { %807 = vst.msk [vmem:[%s1411_s26 + $0x10] sm:$0xff] %vm198_vm0, %v799_v21  ;;  %v800_v30 = vsel %vm776_vm7, %v792_v24, 0.0  ;;  %v794_v33 = vsub.f32 %v770_v25, %v786_v46  ;;  %v772_v35 = vadd.f32 %v764_v28, %v740_v47 }
 0x3d7   : > { %808 = vst.msk [vmem:[%s1411_s26 + $0x18] sm:$0xff] %vm198_vm0, %v800_v30  ;;  %v801_v18 = vsel %vm777_vm8, %v793_v29, 0.0  ;;  %v795_v36 = vsub.f32 %v771_v31, %v787_v27 }
 0x3d8   : > { %809 = vst.msk [vmem:[%s1411_s26 + $0x20] sm:$0xff] %vm198_vm0, %v801_v18  ;;  %v802_v26 = vsel %vm778_vm9, %v794_v33, 0.0  ;;  %v796_v38 = vsub.f32 %v772_v35, %v788_v32 }
 0x3d9   : > { %810 = vst.msk [vmem:[%s1411_s26 + $0x28] sm:$0xff] %vm198_vm0, %v802_v26  ;;  %v803_v23 = vsel %vm779_vm10, %v795_v36, 0.0 }
 0x3da   : > { %811 = vst.msk [vmem:[%s1411_s26 + $0x30] sm:$0xff] %vm198_vm0, %v803_v23  ;;  %v804_v39 = vsel %vm780_vm11, %v796_v38, 0.0 }
 0x3db   : > { %812 = vst.msk [vmem:[%s1411_s26 + $0x38] sm:$0xff] %vm198_vm0, %v804_v39 }
 0x3dc PF: > { %s16_s14 = sadd.s32 1, %s1240_s14   ;;  %s1790_s9 = smov %s1224_s10 }
 0x3dd   : > { %p13_p8 = scmp.ge.s32.totalorder %s16_s14, 4   ;;  %s1791_s10 = smov %s1228_s11 }
 0x3de   : > { %s1792_s11 = smov %s1350_s21  ;;  %s1793_s12 = smov %s1236_s13 }
 0x3df   : > { %s1794_s13 = smov %s1796_s22  ;;  %15 = sbr.rel (!%p13_p8) target bundleno = 5 (0x5), region = 85 }
 0x3e6   :  { %835 = vsyncpa [#allocation6], 1 }
 0x3e7   :  { %837 = vsyncpa [#allocation6 + $0x1], 1 }
 0x3e8   :  { %838 = vsyncpa [#allocation8], 1 }

</bundles_post_ra>
